<compile_context>
chip_gen: v7x
topology: tpu7x:2x2x1
jax: 0.10.0
libtpu: 0.0.40
codegen_flags: <defaults>
</compile_context>

<pallas_src>
import jax
import jax.numpy as jnp
from jax.experimental import pallas as pl
from jax.experimental.pallas import tpu as pltpu

_HID = 128    # padded hidden / logit lane width (all matmuls run 128-wide)
_NEG = -1e30  # bias on padded logit lanes -> exp() underflows to exactly 0


def _round_up(x, m):
    return ((x + m - 1) // m) * m


def _inverse_dynamics_kernel(a_ref, b_ref, w1_ref, w_ref, bias_ref, out_ref):
    wdt = w1_ref.dtype
    bias = bias_ref[...]                       # [4, 128] f32, loaded once

    # Layer 1 (concat-free split-K):
    #   concat(a, b) @ W1 + b1 == a @ W1[:64] + b @ W1[64:] + b1
    h = (jnp.dot(a_ref[...], w1_ref[0], preferred_element_type=jnp.float32)
         + jnp.dot(b_ref[...], w1_ref[1], preferred_element_type=jnp.float32)
         + bias[0:1, :])
    h = jnp.maximum(h, 0.0)

    # Layer 2: 128 -> 64 (zero-padded to 128 output lanes).
    h = jnp.dot(h.astype(wdt), w_ref[0],
                preferred_element_type=jnp.float32) + bias[1:2, :]
    h = jnp.maximum(h, 0.0)

    # Layer 3: 64 -> 64 (zero-padded to 128x128).
    h = jnp.dot(h.astype(wdt), w_ref[1],
                preferred_element_type=jnp.float32) + bias[2:3, :]
    h = jnp.maximum(h, 0.0)

    # Layer 4: 64 -> na, padded to 128 lanes (padded lanes biased to -1e30).
    logits = jnp.dot(h.astype(wdt), w_ref[2],
                     preferred_element_type=jnp.float32) + bias[3:4, :]

    # Numerically stable softmax over the lane-dense feature axis.
    m = jnp.max(logits, axis=1, keepdims=True)
    e = jnp.exp(logits - m)                    # padded lanes -> exactly 0
    denom = jnp.sum(e, axis=1, keepdims=True)
    out_ref[...] = (e * pl.reciprocal(denom, approx=False)).astype(out_ref.dtype)


def _prepare_params(params, param_dtype):
    """Stack/pad all layers into 3 lane-dense tensors."""
    w1, b1 = params["w1"], params["b1"]
    w2, b2 = params["w2"], params["b2"]
    w3, b3 = params["w3"], params["b3"]
    w4, b4 = params["w4"], params["b4"]
    na = w4.shape[1]

    # [2, 64, 128]: split-K halves of W1 (concat-free layer 1).
    w1s = jnp.stack([w1[:64, :], w1[64:, :]]).astype(param_dtype)

    # [3, 128, 128]: layers 2..4, zero-padded to lane-dense 128x128.
    w2p = jnp.zeros((_HID, _HID), param_dtype).at[:, :64].set(w2.astype(param_dtype))
    w3p = jnp.zeros((_HID, _HID), param_dtype).at[:64, :64].set(w3.astype(param_dtype))
    w4p = jnp.zeros((_HID, _HID), param_dtype).at[:64, :na].set(w4.astype(param_dtype))
    ws = jnp.stack([w2p, w3p, w4p])

    # [4, 128] f32 biases; padded logit lanes get -1e30 so softmax is exact.
    b1p = b1.reshape(_HID).astype(jnp.float32)
    b2p = jnp.zeros((_HID,), jnp.float32).at[:64].set(b2.reshape(-1))
    b3p = jnp.zeros((_HID,), jnp.float32).at[:64].set(b3.reshape(-1))
    b4p = jnp.full((_HID,), _NEG, jnp.float32).at[:na].set(b4.reshape(-1))
    bs = jnp.stack([b1p, b2p, b3p, b4p])

    return (w1s, ws, bs), na


def inverse_dynamics(embed_a, embed_b, params, *, tb=None,
                     param_dtype=jnp.float32):
    """embed_a, embed_b: [B, 64]. Returns softmax probabilities [B, na]."""
    B = embed_a.shape[0]
    (w1s, ws, bs), na = _prepare_params(params, param_dtype)

    # Batch tile: multiple of 8; prefer >=2 grid steps (v7x megacore) while
    # amortizing the ~0.35us per-step overhead at large B.
    if tb is None:
        if B >= 4096:
            tb = 1024
        elif B >= 1024:
            tb = 512
        elif B >= 16:
            tb = _round_up(pl.cdiv(B, 2), 8)
        else:
            tb = _round_up(max(B, 1), 8)
    tb = _round_up(tb, 8)

    # Zero-pad the batch to a multiple of tb (padded rows flow through the net
    # harmlessly and are sliced off; no garbage-row NaNs from the DMA tail).
    Bp = _round_up(B, tb)
    if Bp != B:
        pad = Bp - B
        embed_a = jnp.pad(embed_a, ((0, pad), (0, 0)))
        embed_b = jnp.pad(embed_b, ((0, pad), (0, 0)))
    embed_a = embed_a.astype(param_dtype)
    embed_b = embed_b.astype(param_dtype)

    grid = (Bp // tb,)

    act_bytes = jnp.dtype(param_dtype).itemsize
    weight_bytes = sum(int(w.size) * w.dtype.itemsize for w in (w1s, ws, bs))
    cost = pl.CostEstimate(
        flops=2 * Bp * (2 * 64 * _HID + 3 * _HID * _HID),
        transcendentals=Bp * _HID,
        bytes_accessed=2 * Bp * 64 * act_bytes + Bp * _HID * 4 + weight_bytes,
    )

    out = pl.pallas_call(
        _inverse_dynamics_kernel,
        out_shape=jax.ShapeDtypeStruct((Bp, _HID), jnp.float32),
        grid_spec=pltpu.PrefetchScalarGridSpec(
            num_scalar_prefetch=0,
            grid=grid,
            in_specs=[
                pl.BlockSpec((tb, 64), lambda i: (i, 0)),         # embed_a
                pl.BlockSpec((tb, 64), lambda i: (i, 0)),         # embed_b
                pl.BlockSpec(w1s.shape, lambda i: (0, 0, 0)),     # W1 halves
                pl.BlockSpec(ws.shape, lambda i: (0, 0, 0)),      # W2..W4 (padded)
                pl.BlockSpec(bs.shape, lambda i: (0, 0)),         # biases (padded)
            ],
            out_specs=pl.BlockSpec((tb, _HID), lambda i: (i, 0)),  # lane-dense out
        ),
        compiler_params=pltpu.CompilerParams(
            dimension_semantics=("parallel",)),
        cost_estimate=cost,
    )(embed_a, embed_b, w1s, ws, bs)

    return out[:B, :na]


def init_params(key, na):
    """Deterministic synthetic init matching nn.Linear shapes.
    Weights stored as [in, out]; biases as [1, out]."""
    ks = jax.random.split(key, 8)
    dims = [(128, 128), (128, 64), (64, 64), (64, na)]
    params = {}
    for idx, (din, dout) in enumerate(dims, start=1):
        bound = 1.0 / jnp.sqrt(din)
        w = jax.random.uniform(ks[2 * (idx - 1)], (din, dout),
                               jnp.float32, -bound, bound)
        b = jax.random.uniform(ks[2 * (idx - 1) + 1], (1, dout),
                               jnp.float32, -bound, bound)
        params[f"w{idx}"] = w
        params[f"b{idx}"] = b
    return params


def _reference(embed_a, embed_b, params):
    x = jnp.concatenate([embed_a, embed_b], axis=1)
    h = jnp.maximum(x @ params["w1"] + params["b1"], 0.0)
    h = jnp.maximum(h @ params["w2"] + params["b2"], 0.0)
    h = jnp.maximum(h @ params["w3"] + params["b3"], 0.0)
    logits = h @ params["w4"] + params["b4"]
    return jax.nn.softmax(logits, axis=1)


if __name__ == "__main__":
    key = jax.random.PRNGKey(0)
    k_a, k_b, k_p = jax.random.split(key, 3)

    na = 6
    params = init_params(k_p, na)

    # 1) Small-batch f32 path: exact against the pure-JAX reference.
    B = 8
    embed_a = jax.random.normal(k_a, (B, 64), jnp.float32)
    embed_b = jax.random.normal(k_b, (B, 64), jnp.float32)
    out = jax.block_until_ready(inverse_dynamics(embed_a, embed_b, params))
    ref = _reference(embed_a, embed_b, params)
    assert out.shape == (B, na)
    assert jnp.allclose(out, ref, atol=1e-5, rtol=1e-5)
    assert jnp.allclose(jnp.sum(out, axis=1), 1.0, atol=1e-5)

    # 2) Non-multiple-of-8 batch: exercises batch padding + multi-step grid.
    B2 = 100
    e_a2 = jax.random.normal(jax.random.PRNGKey(1), (B2, 64), jnp.float32)
    e_b2 = jax.random.normal(jax.random.PRNGKey(2), (B2, 64), jnp.float32)
    out2 = jax.block_until_ready(inverse_dynamics(e_a2, e_b2, params))
    ref2 = _reference(e_a2, e_b2, params)
    assert out2.shape == (B2, na)
    assert jnp.allclose(out2, ref2, atol=1e-5, rtol=1e-5)

    # 3) bf16 fast path (v6e/v7x MXU): f32 accumulation, f32 softmax.
    out_bf = jax.block_until_ready(
        inverse_dynamics(e_a2, e_b2, params, param_dtype=jnp.bfloat16))
    assert out_bf.shape == (B2, na)
    assert bool(jnp.all(jnp.isfinite(out_bf)))
    assert jnp.allclose(jnp.sum(out_bf, axis=1), 1.0, atol=1e-4)

    print("KERNEL_OK")
</pallas_src>

<mosaic_0001>
module attributes {stable_mosaic.version = 11 : i64} {
  func.func @_inverse_dynamics_kernel(%arg0: i32, %arg1: memref<8x64xf32, #tpu.memory_space<vmem>>, %arg2: memref<8x64xf32, #tpu.memory_space<vmem>>, %arg3: memref<2x64x128xf32, #tpu.memory_space<vmem>>, %arg4: memref<3x128x128xf32, #tpu.memory_space<vmem>>, %arg5: memref<4x128xf32, #tpu.memory_space<vmem>>, %arg6: memref<8x128xf32, #tpu.memory_space<vmem>>) attributes {dimension_semantics = [#tpu.dimension_semantics<parallel>], iteration_bounds = array<i64: 1>, scalar_prefetch = 0 : i64, scratch_operands = 0 : i64, tpu.core_type = #tpu.core_type<tc>, window_params = [{transform_indices = @transform_0, window_bounds = array<i64: 8, 64>}, {transform_indices = @transform_1, window_bounds = array<i64: 8, 64>}, {pipeline_mode = #tpu.pipeline_mode<synchronous>, transform_indices = @transform_2, window_bounds = array<i64: 2, 64, 128>}, {pipeline_mode = #tpu.pipeline_mode<synchronous>, transform_indices = @transform_3, window_bounds = array<i64: 3, 128, 128>}, {pipeline_mode = #tpu.pipeline_mode<synchronous>, transform_indices = @transform_4, window_bounds = array<i64: 4, 128>}, {transform_indices = @transform_5, window_bounds = array<i64: 8, 128>}]} {
    %c0 = arith.constant 0 : index
    %c0_0 = arith.constant 0 : index
    %0 = vector.load %arg5[%c0, %c0_0] : memref<4x128xf32, #tpu.memory_space<vmem>>, vector<4x128xf32>
    %c0_1 = arith.constant 0 : index
    %c0_2 = arith.constant 0 : index
    %1 = vector.load %arg1[%c0_1, %c0_2] : memref<8x64xf32, #tpu.memory_space<vmem>>, vector<8x64xf32>
    %c0_3 = arith.constant 0 : index
    %c0_4 = arith.constant 0 : index
    %c0_5 = arith.constant 0 : index
    %2 = vector.load %arg3[%c0_3, %c0_4, %c0_5] : memref<2x64x128xf32, #tpu.memory_space<vmem>>, vector<1x64x128xf32>
    %3 = vector.shape_cast %2 : vector<1x64x128xf32> to vector<64x128xf32>
    %cst = arith.constant dense<0.000000e+00> : vector<8x128xf32>
    %4 = tpu.matmul %1, %3, %cst {dimension_numbers = #tpu.dot_dimension_numbers<[1], [0], [0], [1], [0, 0, 1, 1], [], []>} : vector<8x64xf32>, vector<64x128xf32>, vector<8x128xf32> -> vector<8x128xf32>
    %c0_6 = arith.constant 0 : index
    %c0_7 = arith.constant 0 : index
    %5 = vector.load %arg2[%c0_6, %c0_7] : memref<8x64xf32, #tpu.memory_space<vmem>>, vector<8x64xf32>
    %c1 = arith.constant 1 : index
    %c0_8 = arith.constant 0 : index
    %c0_9 = arith.constant 0 : index
    %6 = vector.load %arg3[%c1, %c0_8, %c0_9] : memref<2x64x128xf32, #tpu.memory_space<vmem>>, vector<1x64x128xf32>
    %7 = vector.shape_cast %6 : vector<1x64x128xf32> to vector<64x128xf32>
    %cst_10 = arith.constant dense<0.000000e+00> : vector<8x128xf32>
    %8 = tpu.matmul %5, %7, %cst_10 {dimension_numbers = #tpu.dot_dimension_numbers<[1], [0], [0], [1], [0, 0, 1, 1], [], []>} : vector<8x64xf32>, vector<64x128xf32>, vector<8x128xf32> -> vector<8x128xf32>
    %9 = arith.addf %4, %8 : vector<8x128xf32>
    %10 = vector.extract_strided_slice %0 {offsets = [0, 0], sizes = [1, 128], strides = [1, 1]} : vector<4x128xf32> to vector<1x128xf32>
    %11 = vector.broadcast %10 : vector<1x128xf32> to vector<8x128xf32>
    %12 = arith.addf %9, %11 : vector<8x128xf32>
    %cst_11 = arith.constant 0.000000e+00 : f32
    %13 = vector.broadcast %cst_11 : f32 to vector<8x128xf32>
    %14 = arith.maximumf %12, %13 : vector<8x128xf32>
    %c0_12 = arith.constant 0 : index
    %c0_13 = arith.constant 0 : index
    %c0_14 = arith.constant 0 : index
    %15 = vector.load %arg4[%c0_12, %c0_13, %c0_14] : memref<3x128x128xf32, #tpu.memory_space<vmem>>, vector<1x128x128xf32>
    %16 = vector.shape_cast %15 : vector<1x128x128xf32> to vector<128x128xf32>
    %cst_15 = arith.constant dense<0.000000e+00> : vector<8x128xf32>
    %17 = tpu.matmul %14, %16, %cst_15 {dimension_numbers = #tpu.dot_dimension_numbers<[1], [0], [0], [1], [0, 0, 1, 1], [], []>} : vector<8x128xf32>, vector<128x128xf32>, vector<8x128xf32> -> vector<8x128xf32>
    %18 = vector.extract_strided_slice %0 {offsets = [1, 0], sizes = [1, 128], strides = [1, 1]} : vector<4x128xf32> to vector<1x128xf32>
    %19 = vector.broadcast %18 : vector<1x128xf32> to vector<8x128xf32>
    %20 = arith.addf %17, %19 : vector<8x128xf32>
    %cst_16 = arith.constant 0.000000e+00 : f32
    %21 = vector.broadcast %cst_16 : f32 to vector<8x128xf32>
    %22 = arith.maximumf %20, %21 : vector<8x128xf32>
    %c1_17 = arith.constant 1 : index
    %c0_18 = arith.constant 0 : index
    %c0_19 = arith.constant 0 : index
    %23 = vector.load %arg4[%c1_17, %c0_18, %c0_19] : memref<3x128x128xf32, #tpu.memory_space<vmem>>, vector<1x128x128xf32>
    %24 = vector.shape_cast %23 : vector<1x128x128xf32> to vector<128x128xf32>
    %cst_20 = arith.constant dense<0.000000e+00> : vector<8x128xf32>
    %25 = tpu.matmul %22, %24, %cst_20 {dimension_numbers = #tpu.dot_dimension_numbers<[1], [0], [0], [1], [0, 0, 1, 1], [], []>} : vector<8x128xf32>, vector<128x128xf32>, vector<8x128xf32> -> vector<8x128xf32>
    %26 = vector.extract_strided_slice %0 {offsets = [2, 0], sizes = [1, 128], strides = [1, 1]} : vector<4x128xf32> to vector<1x128xf32>
    %27 = vector.broadcast %26 : vector<1x128xf32> to vector<8x128xf32>
    %28 = arith.addf %25, %27 : vector<8x128xf32>
    %cst_21 = arith.constant 0.000000e+00 : f32
    %29 = vector.broadcast %cst_21 : f32 to vector<8x128xf32>
    %30 = arith.maximumf %28, %29 : vector<8x128xf32>
    %c2 = arith.constant 2 : index
    %c0_22 = arith.constant 0 : index
    %c0_23 = arith.constant 0 : index
    %31 = vector.load %arg4[%c2, %c0_22, %c0_23] : memref<3x128x128xf32, #tpu.memory_space<vmem>>, vector<1x128x128xf32>
    %32 = vector.shape_cast %31 : vector<1x128x128xf32> to vector<128x128xf32>
    %cst_24 = arith.constant dense<0.000000e+00> : vector<8x128xf32>
    %33 = tpu.matmul %30, %32, %cst_24 {dimension_numbers = #tpu.dot_dimension_numbers<[1], [0], [0], [1], [0, 0, 1, 1], [], []>} : vector<8x128xf32>, vector<128x128xf32>, vector<8x128xf32> -> vector<8x128xf32>
    %34 = vector.extract_strided_slice %0 {offsets = [3, 0], sizes = [1, 128], strides = [1, 1]} : vector<4x128xf32> to vector<1x128xf32>
    %35 = vector.broadcast %34 : vector<1x128xf32> to vector<8x128xf32>
    %36 = arith.addf %33, %35 : vector<8x128xf32>
    %cst_25 = arith.constant dense<0xFF800000> : vector<8xf32>
    %37 = vector.multi_reduction <maximumf>, %36, %cst_25 [1] : vector<8x128xf32> to vector<8xf32>
    %38 = vector.shape_cast %37 : vector<8xf32> to vector<8x1xf32>
    %39 = vector.broadcast %38 : vector<8x1xf32> to vector<8x128xf32>
    %40 = arith.subf %36, %39 : vector<8x128xf32>
    %41 = math.exp %40 : vector<8x128xf32>
    %cst_26 = arith.constant dense<0.000000e+00> : vector<8xf32>
    %42 = vector.multi_reduction <add>, %41, %cst_26 [1] : vector<8x128xf32> to vector<8xf32>
    %43 = vector.shape_cast %42 : vector<8xf32> to vector<8x1xf32>
    %44 = tpu.reciprocal %43 : vector<8x1xf32> -> vector<8x1xf32>
    %45 = vector.broadcast %44 : vector<8x1xf32> to vector<8x128xf32>
    %46 = arith.mulf %41, %45 : vector<8x128xf32>
    %c0_27 = arith.constant 0 : index
    %c0_28 = arith.constant 0 : index
    %47 = vector.load %arg6[%c0_27, %c0_28] : memref<8x128xf32, #tpu.memory_space<vmem>>, vector<8x128xf32>
    tpu.vector_store %arg6[%c0_27, %c0_28], %46 {strides = array<i32>} : memref<8x128xf32, #tpu.memory_space<vmem>>, vector<8x128xf32>,
    return
  }
  func.func @transform_0(%arg0: i32) -> (i32, i32) {
    %c0_i32 = arith.constant 0 : i32
    %c0_i32_0 = arith.constant 0 : i32
    return %arg0, %c0_i32 : i32, i32
  }
  func.func @transform_1(%arg0: i32) -> (i32, i32) {
    %c0_i32 = arith.constant 0 : i32
    %c0_i32_0 = arith.constant 0 : i32
    return %arg0, %c0_i32 : i32, i32
  }
  func.func @transform_2(%arg0: i32) -> (i32, i32, i32) {
    %c0_i32 = arith.constant 0 : i32
    %c0_i32_0 = arith.constant 0 : i32
    %c0_i32_1 = arith.constant 0 : i32
    %c0_i32_2 = arith.constant 0 : i32
    return %c0_i32, %c0_i32_0, %c0_i32_1 : i32, i32, i32
  }
  func.func @transform_3(%arg0: i32) -> (i32, i32, i32) {
    %c0_i32 = arith.constant 0 : i32
    %c0_i32_0 = arith.constant 0 : i32
    %c0_i32_1 = arith.constant 0 : i32
    %c0_i32_2 = arith.constant 0 : i32
    return %c0_i32, %c0_i32_0, %c0_i32_1 : i32, i32, i32
  }
  func.func @transform_4(%arg0: i32) -> (i32, i32) {
    %c0_i32 = arith.constant 0 : i32
    %c0_i32_0 = arith.constant 0 : i32
    %c0_i32_1 = arith.constant 0 : i32
    return %c0_i32, %c0_i32_0 : i32, i32
  }
  func.func @transform_5(%arg0: i32) -> (i32, i32) {
    %c0_i32 = arith.constant 0 : i32
    %c0_i32_0 = arith.constant 0 : i32
    return %arg0, %c0_i32 : i32, i32
  }
}

</mosaic_0001>

<bundles_post_ra>
// kernel: tpu_custom_call.1
= control target key start
LH: loop header
LB: loop body
LE: loop exit
PB: predicated region body
PF: predicated region fallthrough
CT: control target
= control target key end

     0   :  { %10 = vsyncpa [#allocation3], 0  ;;  %s1147_s0 = inlined_call_operand.hbm [shape: f32[8,64], index: 0, kind: input, shape index: {}]   ;;  %s1148_s1 = inlined_call_operand.hbm [shape: f32[8,64], index: 1, kind: input, shape index: {}]   ;;  %s1149_s2 = inlined_call_operand.hbm [shape: f32[2,64,128], index: 2, kind: input, shape index: {}]   ;;  %s1150_s3 = inlined_call_operand.hbm [shape: f32[3,128,128], index: 3, kind: input, shape index: {}]   ;;  %s1151_s4 = inlined_call_operand.vmem [shape: f32[4,128], index: 4, kind: input, shape index: {}]   ;;  %s1152_s5 = inlined_call_operand.hbm [shape: f32[8,128], index: 5, kind: output, shape index: {}]  }
   0x1   :  { %11 = vsyncpa [#allocation6], 0 }
   0x2   :  { %12 = vsyncpa [#allocation9], 0 }
   0x3   :  { %13 = vsyncpa [#allocation4], 0  ;;  %s988_s18 = smov [#allocation5]   ;;  %s989_s20 = smov [#allocation2]  }
   0x4   :  { %s30_s19 = sshll.u32 %s988_s18, 4  ;;  %s20_s21 = sshll.u32 %s989_s20, 4  ;;  %s31_s19 = int_to_ptr.vmem [resolvable:$true] %s30_s19  ;;  %s21_s21 = int_to_ptr.vmem [resolvable:$true] %s20_s21 }
   0x5   :  { %s870_s24 = scalar_lea.hbm %s1148_s1, 128 }
   0x6   :  { %p871_p0 = scmp.ne.s32.totalorder %s1148_s1, %s870_s24  ;;  %p874_p1 = scmp.lt.u32.totalorder %s870_s24, %s1148_s1 }
   0x8   :  { %p876_p2 = pnand %p874_p1, %p871_p0 }
   0xa   :  { %879 = shalt.err (!%p876_p2)
}
   0xb   :  { %s880_s29 = scalar_lea.vmem %s31_s19, 128  ;;  %p885_p4 = scmp.lt.s32.totalorder %s31_s19, %s31_s19 }
   0xc   :  { %p881_p3 = scmp.ne.s32.totalorder %s31_s19, %s880_s29  ;;  %p886_p5 = scmp.lt.s32.totalorder %s880_s29, %s880_s29 }
   0xe   :  { %p887_p6 = por %p886_p5, %p885_p4 }
  0x10   :  { %p888_p7 = pnand %p887_p6, %p881_p3 }
  0x12   :  { %891 = shalt.err (!%p888_p7)
}
  0x13   :  { %33 = dma.hbm_to_vmem [thread:$0]  %s1148_s1, 128, %s31_s19, [#allocation6]  }
  0x14   :  { %s892_s9 = scalar_lea.hbm %s1147_s0, 128 }
  0x15   :  { %p893_p8 = scmp.ne.s32.totalorder %s1147_s0, %s892_s9  ;;  %p896_p9 = scmp.lt.u32.totalorder %s892_s9, %s1147_s0 }
  0x17   :  { %p898_p10 = pnand %p896_p9, %p893_p8 }
  0x19   :  { %901 = shalt.err (!%p898_p10)
}
  0x1a   :  { %s902_s14 = scalar_lea.vmem %s21_s21, 128  ;;  %p907_p12 = scmp.lt.s32.totalorder %s21_s21, %s21_s21 }
  0x1b   :  { %p903_p11 = scmp.ne.s32.totalorder %s21_s21, %s902_s14  ;;  %p908_p13 = scmp.lt.s32.totalorder %s902_s14, %s902_s14 }
  0x1d   :  { %p909_p0 = por %p908_p13, %p907_p12 }
  0x1f   :  { %p910_p1 = pnand %p909_p0, %p903_p11 }
  0x21   :  { %913 = shalt.err (!%p910_p1)
}
  0x22   :  { %23 = dma.hbm_to_vmem [thread:$0]  %s1147_s0, 128, %s21_s21, [#allocation3]  }
  0x23   :  { %s990_s16 = smov [#allocation7]   ;;  %s914_s20 = scalar_lea.hbm %s1149_s2, 2048 }
  0x24   :  { %s39_s17 = sshll.u32 %s990_s16, 4  ;;  %p915_p2 = scmp.ne.s32.totalorder %s1149_s2, %s914_s20  ;;  %s40_s17 = int_to_ptr.vmem [resolvable:$true] %s39_s17 }
  0x25   :  { %p918_p3 = scmp.lt.u32.totalorder %s914_s20, %s1149_s2 }
  0x27   :  { %p920_p4 = pnand %p918_p3, %p915_p2 }
  0x29   :  { %923 = shalt.err (!%p920_p4)
}
  0x2a   :  { %s924_s26 = scalar_lea.vmem %s40_s17, 2048  ;;  %p929_p6 = scmp.lt.s32.totalorder %s40_s17, %s40_s17 }
  0x2b   :  { %p925_p5 = scmp.ne.s32.totalorder %s40_s17, %s924_s26  ;;  %p930_p7 = scmp.lt.s32.totalorder %s924_s26, %s924_s26 }
  0x2d   :  { %p931_p8 = por %p930_p7, %p929_p6 }
  0x2f   :  { %p932_p9 = pnand %p931_p8, %p925_p5 }
  0x31   :  { %935 = shalt.err (!%p932_p9)
}
  0x32   :  { %s991_s0 = smov 128   ;;  %s992_s21 = smov 8  }
  0x33   :  { %45 = dma.hbm_to_vmem [thread:$0]  %s1149_s2, 2048, %s40_s17, [#allocation6], %s991_s0, %s991_s0, %s992_s21  }
  0x34   :  { %s993_s29 = smov [#allocation8]   ;;  %s936_s8 = scalar_lea.hbm %s1150_s3, 6144 }
  0x35   :  { %s51_s30 = sshll.u32 %s993_s29, 4  ;;  %p937_p10 = scmp.ne.s32.totalorder %s1150_s3, %s936_s8  ;;  %s52_s30 = int_to_ptr.vmem [resolvable:$true] %s51_s30 }
  0x36   :  { %p940_p11 = scmp.lt.u32.totalorder %s936_s8, %s1150_s3 }
  0x38   :  { %p942_p12 = pnand %p940_p11, %p937_p10 }
  0x3a   :  { %945 = shalt.err (!%p942_p12)
}
  0x3b   :  { %s946_s13 = scalar_lea.vmem %s52_s30, 6144  ;;  %p951_p0 = scmp.lt.s32.totalorder %s52_s30, %s52_s30 }
  0x3c   :  { %p947_p13 = scmp.ne.s32.totalorder %s52_s30, %s946_s13  ;;  %p952_p1 = scmp.lt.s32.totalorder %s946_s13, %s946_s13 }
  0x3e   :  { %p953_p2 = por %p952_p1, %p951_p0 }
  0x40   :  { %p954_p3 = pnand %p953_p2, %p947_p13 }
  0x42   :  { %957 = shalt.err (!%p954_p3)
}
  0x43   :  { %57 = dma.hbm_to_vmem [thread:$0]  %s1150_s3, 6144, %s52_s30, [#allocation9], %s991_s0, %s991_s0, %s992_s21  }
  0x44   :  { %980 = dma.done.wait [#allocation3], 128  }
  0x45   :  { %981 = vsyncadd [#allocation3], 4294967168 }
  0x46   :  { %982 = dma.done.wait [#allocation6], 2176  }
  0x47   :  { %983 = vsyncadd [#allocation6], 4294965120 }
  0x48   :  { %984 = dma.done.wait [#allocation9], 6144  }
  0x49   :  { %985 = vsyncadd [#allocation9], 4294961152  ;;  %v994_v0 = vmov 0.0|0.0   ;;  %vm995_vm0 = vmmov 0   ;;  %v996_v1 = vmov 0.0   ;;  %v84_v2 = vld [vmem:[#allocation7 + $0x40] sm:$0xff] }
  0x4a   :  { %760 = vmatprep.subr.bf16.mxu1 %v994_v0  ;;  %633 = vmatprep.mubr.msk.f32.mxu1 %vm995_vm0, %v996_v1  ;;  %v85_v3 = vld [vmem:[#allocation7 + $0x48] sm:$0xff]  ;;  %v86_v4 = vld [vmem:[#allocation7 + $0x50] sm:$0xff]  ;;  %v87_v6 = vld [vmem:[#allocation7 + $0x58] sm:$0xff]  ;;  %vm92_vm1 = vcmask 523264  }
  0x4b   :  { %784 = vmatprep.subr.bf16.mxu0 %v994_v0  ;;  %687 = vmatprep.mubr.msk.f32.mxu0 %vm995_vm0, %v996_v1  ;;  %v761_v5 = vpack.c.bf16 %v85_v3, %v84_v2  ;;  %v764_v7 = vpack.c.bf16 %v87_v6, %v86_v4  ;;  %v88_v8 = vld [vmem:[#allocation7 + $0x60] sm:$0xff]  ;;  %v89_v9 = vld [vmem:[#allocation7 + $0x68] sm:$0xff]  ;;  %v247_v12 = vld [vmem:[#allocation8 + $0x10] sm:$0xff] }
  0x4c   :  { %v245_v10 = vld [vmem:[#allocation8] sm:$0xff]  ;;  %v246_v11 = vld [vmem:[#allocation8 + $0x8] sm:$0xff]  ;;  %v767_v13 = vpack.c.bf16 %v89_v9, %v88_v8  ;;  %v248_v15 = vld [vmem:[#allocation8 + $0x18] sm:$0xff] }
  0x4d   :  { %762 = vmatpush3.bf16.msra.mxu1 %v761_v5  ;;  %v785_v14 = vpack.c.bf16 %v246_v11, %v245_v10  ;;  %v90_v16 = vld [vmem:[#allocation7 + $0x70] sm:$0xff]  ;;  %v91_v17 = vld [vmem:[#allocation7 + $0x78] sm:$0xff]  ;;  %v788_v18 = vpack.c.bf16 %v248_v15, %v247_v12  ;;  %v74_v20 = vld [vmem:[#allocation7] sm:$0xff] }
  0x4e   :  { %763 = vmatprep.subr.bf16.mxu1 %v994_v0  ;;  %v770_v19 = vpack.c.bf16 %v91_v17, %v90_v16  ;;  %v75_v21 = vld [vmem:[#allocation7 + $0x8] sm:$0xff]  ;;  %v82_v22 = vld [vmem:[#allocation5] sm:$0xff]  ;;  %v76_v24 = vld [vmem:[#allocation7 + $0x10] sm:$0xff] }
  0x4f   :  { %786 = vmatpush3.bf16.msra.mxu0 %v785_v14  ;;  %v773_v23 = vpack.c.bf16 %v75_v21, %v74_v20  ;;  %v77_v25 = vld [vmem:[#allocation7 + $0x18] sm:$0xff]  ;;  %v78_v27 = vld [vmem:[#allocation7 + $0x20] sm:$0xff]  ;;  %v79_v28 = vld [vmem:[#allocation7 + $0x28] sm:$0xff] }
  0x50   :  { %787 = vmatprep.subr.bf16.mxu0 %v994_v0  ;;  %v776_v26 = vpack.c.bf16 %v77_v25, %v76_v24  ;;  %v779_v29 = vpack.c.bf16 %v79_v28, %v78_v27  ;;  %v80_v30 = vld [vmem:[#allocation7 + $0x30] sm:$0xff]  ;;  %v81_v31 = vld [vmem:[#allocation7 + $0x38] sm:$0xff]  ;;  %v249_v34 = vld [vmem:[#allocation8 + $0x20] sm:$0xff] }
  0x51   :  { %765 = vmatpush3.bf16.msra.mxu1 %v764_v7  ;;  %v782_v32 = vpack.c.bf16 %v81_v31, %v80_v30  ;;  %v73_v33 = vld [vmem:[#allocation2] sm:$0xff]  ;;  %v250_v35 = vld [vmem:[#allocation8 + $0x28] sm:$0xff]  ;;  %v252_v38 = vld [vmem:[#allocation8 + $0x38] sm:$0xff] }
  0x52   :  { %766 = vmatprep.subr.bf16.mxu1 %v994_v0  ;;  %v791_v36 = vpack.c.bf16 %v250_v35, %v249_v34  ;;  %v251_v37 = vld [vmem:[#allocation8 + $0x30] sm:$0xff]  ;;  %v253_v39 = vld [vmem:[#allocation8 + $0x40] sm:$0xff]  ;;  %v254_v41 = vld [vmem:[#allocation8 + $0x48] sm:$0xff] }
  0x53   :  { %789 = vmatpush3.bf16.msra.mxu0 %v788_v18  ;;  %v794_v40 = vpack.c.bf16 %v252_v38, %v251_v37  ;;  %v797_v42 = vpack.c.bf16 %v254_v41, %v253_v39  ;;  %v255_v43 = vld [vmem:[#allocation8 + $0x50] sm:$0xff]  ;;  %v256_v44 = vld [vmem:[#allocation8 + $0x58] sm:$0xff]  ;;  %v257_v46 = vld [vmem:[#allocation8 + $0x60] sm:$0xff] }
  0x54   :  { %790 = vmatprep.subr.bf16.mxu0 %v994_v0  ;;  %v800_v45 = vpack.c.bf16 %v256_v44, %v255_v43  ;;  %v258_v47 = vld [vmem:[#allocation8 + $0x68] sm:$0xff]  ;;  %v259_v49 = vld [vmem:[#allocation8 + $0x70] sm:$0xff]  ;;  %v260_v50 = vld [vmem:[#allocation8 + $0x78] sm:$0xff] }
  0x55   :  { %768 = vmatpush3.bf16.msra.mxu1 %v767_v13  ;;  %v803_v48 = vpack.c.bf16 %v258_v47, %v257_v46  ;;  %v806_v51 = vpack.c.bf16 %v260_v50, %v259_v49  ;;  %v337_v52 = vld [vmem:[#allocation8 + $0x80] sm:$0xff]  ;;  %v338_v53 = vld [vmem:[#allocation8 + $0x88] sm:$0xff]  ;;  %v339_v54 = vld [vmem:[#allocation8 + $0x90] sm:$0xff]  ;;  %v239_v13 = vlaneseq }
  0x56   :  { %769 = vmatprep.subr.bf16.mxu1 %v994_v0  ;;  %v809_v55 = vpack.c.bf16 %v338_v53, %v337_v52  ;;  %v340_v56 = vld [vmem:[#allocation8 + $0x98] sm:$0xff]  ;;  %v341_v58 = vld [vmem:[#allocation8 + $0xa0] sm:$0xff]  ;;  %v342_v59 = vld [vmem:[#allocation8 + $0xa8] sm:$0xff] }
  0x57   :  { %792 = vmatpush3.bf16.msra.mxu0 %v791_v36  ;;  %v812_v57 = vpack.c.bf16 %v340_v56, %v339_v54  ;;  %v815_v60 = vpack.c.bf16 %v342_v59, %v341_v58  ;;  %v343_v61 = vld [vmem:[#allocation8 + $0xb0] sm:$0xff]  ;;  %v344_v62 = vld [vmem:[#allocation8 + $0xb8] sm:$0xff]  ;;  %v345_v2 = vld [vmem:[#allocation8 + $0xc0] sm:$0xff]  ;;  %v1111_v14 = vshrl.u32 %v239_v13, 7 }
  0x58   :  { %793 = vmatprep.subr.bf16.mxu0 %v994_v0  ;;  %v818_v63 = vpack.c.bf16 %v344_v62, %v343_v61  ;;  %v346_v3 = vld [vmem:[#allocation8 + $0xc8] sm:$0xff]  ;;  %v347_v5 = vld [vmem:[#allocation8 + $0xd0] sm:$0xff]  ;;  %v348_v6 = vld [vmem:[#allocation8 + $0xd8] sm:$0xff] }
  0x59   :  { %771 = vmatpush3.bf16.msra.mxu1 %v770_v19  ;;  %v821_v4 = vpack.c.bf16 %v346_v3, %v345_v2  ;;  %v824_v7 = vpack.c.bf16 %v348_v6, %v347_v5  ;;  %v349_v8 = vld [vmem:[#allocation8 + $0xe0] sm:$0xff]  ;;  %v350_v9 = vld [vmem:[#allocation8 + $0xe8] sm:$0xff]  ;;  %v241_v15 = vsub.s32 0, %v1111_v14  ;;  %v1117_v16 = vld [vmem:[%s1151_s4] sm:$0xf]  ;;  %v263_v46 = vsub.s32 1, %v1111_v14 }
  0x5a   :  { %772 = vmatprep.subr.bf16.mxu1 %v994_v0  ;;  %v827_v10 = vpack.c.bf16 %v350_v9, %v349_v8  ;;  %v352_v24 = vld [vmem:[#allocation8 + $0xf8] sm:$0xff]  ;;  %v430_v27 = vld [vmem:[#allocation8 + $0x108] sm:$0xff]  ;;  %v431_v28 = vld [vmem:[#allocation8 + $0x110] sm:$0xff]  ;;  %s997_s4 = smov [#allocation10]  }
  0x5b   :  { %795 = vmatpush3.bf16.msra.mxu0 %v794_v40  ;;  %v242_v17 = vrot.slane %v1117_v16, %v241_v15  ;;  %v432_v30 = vld [vmem:[#allocation8 + $0x118] sm:$0xff]  ;;  %v437_v37 = vld [vmem:[#allocation8 + $0x140] sm:$0xff]  ;;  %v438_v38 = vld [vmem:[#allocation8 + $0x148] sm:$0xff]  ;;  %v264_v47 = vrot.slane %v1117_v16, %v263_v46  ;;  %s535_s15 = sshll.u32 %s997_s4, 4  ;;  %s536_s15 = int_to_ptr.vmem [resolvable:$true] %s535_s15 }
  0x5c   :  { %634 = vmatmul.mubr.msk.f32.vlgmr.msra.gmra.mrb[0].mxu1 %vm92_vm1, %v82_v22  ;;  %796 = vmatprep.subr.bf16.mxu0 %v994_v0  ;;  %v836_v31 = vpack.c.bf16 %v432_v30, %v431_v28  ;;  %v436_v35 = vld [vmem:[#allocation8 + $0x138] sm:$0xff]  ;;  %v845_v39 = vpack.c.bf16 %v438_v38, %v437_v37  ;;  %v439_v40 = vld [vmem:[#allocation8 + $0x150] sm:$0xff]  ;;  %v441_v43 = vld [vmem:[#allocation8 + $0x160] sm:$0xff]  ;;  %s958_s16 = scalar_lea.vmem %s536_s15, 128  ;;  %p963_p5 = scmp.lt.s32.totalorder %s536_s15, %s536_s15 }
  0x5d   :  { %774 = vmatpush3.bf16.msra.mxu1 %v773_v23  ;;  %652 = vmatprep.mubr.msk.f32.mxu1 %vm995_vm0, %v996_v1  ;;  %v351_v23 = vld [vmem:[#allocation8 + $0xf0] sm:$0xff]  ;;  %v440_v41 = vld [vmem:[#allocation8 + $0x158] sm:$0xff]  ;;  %v442_v44 = vld [vmem:[#allocation8 + $0x168] sm:$0xff]  ;;  %p959_p4 = scmp.ne.s32.totalorder %s536_s15, %s958_s16  ;;  %p964_p6 = scmp.lt.s32.totalorder %s958_s16, %s958_s16 }
  0x5e   :  { %775 = vmatprep.subr.bf16.mxu1 %v994_v0  ;;  %v830_v25 = vpack.c.bf16 %v352_v24, %v351_v23  ;;  %v443_v52 = vld [vmem:[#allocation8 + $0x170] sm:$0xff]  ;;  %v444_v53 = vld [vmem:[#allocation8 + $0x178] sm:$0xff] }
  0x5f   :  { %798 = vmatpush3.bf16.msra.mxu0 %v797_v42  ;;  %v848_v42 = vpack.c.bf16 %v440_v41, %v439_v40  ;;  %v854_v54 = vpack.c.bf16 %v444_v53, %v443_v52  ;;  %p965_p7 = por %p964_p6, %p963_p5 }
  0x60   :  { %799 = vmatprep.subr.bf16.mxu0 %v994_v0 }
  0x61   :  { %777 = vmatpush3.bf16.msra.mxu1 %v776_v26  ;;  %v429_v26 = vld [vmem:[#allocation8 + $0x100] sm:$0xff]  ;;  %p966_p8 = pnand %p965_p7, %p959_p4 }
  0x62   :  { %778 = vmatprep.subr.bf16.mxu1 %v994_v0 }
  0x63   :  { %801 = vmatpush3.bf16.msra.mxu0 %v800_v45  ;;  %v851_v45 = vpack.c.bf16 %v442_v44, %v441_v43 }
  0x64   :  { %802 = vmatprep.subr.bf16.mxu0 %v994_v0 }
  0x65   :  { %780 = vmatpush3.bf16.msra.mxu1 %v779_v29  ;;  %v833_v29 = vpack.c.bf16 %v430_v27, %v429_v26 }
  0x66   :  { %781 = vmatprep.subr.bf16.mxu1 %v994_v0 }
  0x67   :  { %804 = vmatpush3.bf16.msra.mxu0 %v803_v48 }
  0x68   :  { %805 = vmatprep.subr.bf16.mxu0 %v994_v0 }
  0x69   :  { %783 = vmatpush3.bf16.msra.mxu1 %v782_v32  ;;  %v433_v32 = vld [vmem:[#allocation8 + $0x120] sm:$0xff] }
  0x6a   :  { %808 = vmatprep.subr.bf16.mxu1 %v994_v0 }
  0x6b   :  { %807 = vmatpush3.bf16.msra.mxu0 %v806_v51 }
  0x6c   :  { %653 = vmatmul.mubr.msk.f32.vlgmr.msra.gmra.mrb[2].mxu1 %vm92_vm1, %v73_v33  ;;  %832 = vmatprep.subr.bf16.mxu0 %v994_v0  ;;  %v434_v33 = vld [vmem:[#allocation8 + $0x128] sm:$0xff] }
  0x6d   :  { %722 = vmatprep.mubr.msk.f32.mxu1 %vm995_vm0, %v996_v1  ;;  %810 = vmatpush3.bf16.msra.mxu1 %v809_v55  ;;  %v839_v34 = vpack.c.bf16 %v434_v33, %v433_v32  ;;  %v355_v55 = vsub.s32 2, %v1111_v14 }
  0x6e   :  { %811 = vmatprep.subr.bf16.mxu1 %v994_v0 }
  0x6f   :  { %v356_v56 = vrot.slane %v1117_v16, %v355_v55 }
  0x71   :  { %813 = vmatpush3.bf16.msra.mxu1 %v812_v57 }
  0x72   :  { %814 = vmatprep.subr.bf16.mxu1 %v994_v0 }
  0x75   :  { %816 = vmatpush3.bf16.msra.mxu1 %v815_v60  ;;  %v447_v60 = vsub.s32 3, %v1111_v14 }
  0x76   :  { %817 = vmatprep.subr.bf16.mxu1 %v994_v0 }
  0x77   :  { %v448_v61 = vrot.slane %v1117_v16, %v447_v60 }
  0x79   :  { %819 = vmatpush3.bf16.msra.mxu1 %v818_v63 }
  0x7a   :  { %820 = vmatprep.subr.bf16.mxu1 %v994_v0 }
  0x7d   :  { %822 = vmatpush3.bf16.msra.mxu1 %v821_v4 }
  0x7e   :  { %823 = vmatprep.subr.bf16.mxu1 %v994_v0 }
  0x81   :  { %825 = vmatpush3.bf16.msra.mxu1 %v824_v7 }
  0x82   :  { %826 = vmatprep.subr.bf16.mxu1 %v994_v0 }
  0x85   :  { %828 = vmatpush3.bf16.msra.mxu1 %v827_v10 }
  0x86   :  { %829 = vmatprep.subr.bf16.mxu1 %v994_v0 }
  0x89   :  { %831 = vmatpush3.bf16.msra.mxu1 %v830_v25 }
 0x12f   :  { %v162_v11 = vpop.f32.mrb[0].mxu1 }
 0x130   :  { %v635_v12 = vpop.f32.mrb[1].mxu1 }
 0x13f   :  { %v235_v18 = vpop.f32.mrb[2].mxu1 }
 0x140   :  { %v236_v19 = vadd.f32 %v235_v18, %v162_v11  ;;  %v654_v20 = vpop.f32.mrb[3].mxu1 }
 0x142   :  { %v243_v21 = vadd.f32 %v242_v17, %v236_v19 }
 0x144   :  { %v244_v22 = vmax.f32 %v243_v21, 0.0 }
 0x146   :  { %688 = vmatmul.mubr.f32.vlgmr.msra.gmra.mrb[0].mxu0 %v244_v22 }
 0x147   :  { %757 = vmatprep.mubr.msk.f32.mxu0 %vm995_vm0, %v996_v1  ;;  %834 = vmatpush3.bf16.msra.mxu0 %v833_v29  ;;  %v435_v1 = vld [vmem:[#allocation8 + $0x130] sm:$0xff] }
 0x148   :  { %835 = vmatprep.subr.bf16.mxu0 %v994_v0  ;;  %v842_v36 = vpack.c.bf16 %v436_v35, %v435_v1 }
 0x14b   :  { %837 = vmatpush3.bf16.msra.mxu0 %v836_v31 }
 0x14c   :  { %838 = vmatprep.subr.bf16.mxu0 %v994_v0 }
 0x14f   :  { %840 = vmatpush3.bf16.msra.mxu0 %v839_v34 }
 0x150   :  { %841 = vmatprep.subr.bf16.mxu0 %v994_v0 }
 0x153   :  { %843 = vmatpush3.bf16.msra.mxu0 %v842_v36 }
 0x154   :  { %844 = vmatprep.subr.bf16.mxu0 %v994_v0 }
 0x157   :  { %846 = vmatpush3.bf16.msra.mxu0 %v845_v39 }
 0x158   :  { %847 = vmatprep.subr.bf16.mxu0 %v994_v0 }
 0x15b   :  { %849 = vmatpush3.bf16.msra.mxu0 %v848_v42 }
 0x15c   :  { %850 = vmatprep.subr.bf16.mxu0 %v994_v0 }
 0x15f   :  { %852 = vmatpush3.bf16.msra.mxu0 %v851_v45 }
 0x160   :  { %853 = vmatprep.subr.bf16.mxu0 %v994_v0 }
 0x163   :  { %855 = vmatpush3.bf16.msra.mxu0 %v854_v54 }
 0x219   :  { %v331_v48 = vpop.f32.mrb[0].mxu0 }
 0x21a   :  { %v332_v49 = vadd.f32 %v331_v48, %v264_v47  ;;  %v689_v50 = vpop.f32.mrb[1].mxu0 }
 0x21c   :  { %v335_v51 = vmax.f32 %v332_v49, 0.0 }
 0x21e   :  { %723 = vmatmul.mubr.f32.vlgmr.msra.gmra.mrb[4].mxu1 %v335_v51 }
 0x2f1   :  { %v423_v57 = vpop.f32.mrb[4].mxu1 }
 0x2f2   :  { %v424_v58 = vadd.f32 %v423_v57, %v356_v56  ;;  %v724_v0 = vpop.f32.mrb[5].mxu1 }
 0x2f4   :  { %v427_v59 = vmax.f32 %v424_v58, 0.0 }
 0x2f6   :  { %758 = vmatmul.mubr.f32.vlgmr.msra.gmra.mrb[2].mxu0 %v427_v59 }
 0x3c9   :  { %v515_v62 = vpop.f32.mrb[2].mxu0 }
 0x3ca   :  { %v516_v63 = vadd.f32 %v515_v62, %v448_v61  ;;  %v759_v2 = vpop.f32.mrb[3].mxu0 }
 0x3cc   :  { %519 = vmax.xlane.f32.xlu0 %v516_v63 }
 0x459   :  { %v520_v3 = vpop.xlane.xlu0 %519 }
 0x45a   :  { %v521_v4 = vsub.f32 %v516_v63, %v520_v3 }
 0x45c   :  { %v522_v5 = vmul.f32 1.442695, %v521_v4 }
 0x45e   :  { %866 = vpow2.f32 %v522_v5 }
 0x468   :  { %v867_v6 = vpop.eup %866 }
 0x469   :  { %524 = vadd.xlane.f32.xlu0 %v867_v6 }
 0x4f6   :  { %v525_v7 = vpop.xlane.xlu0 %524 }
 0x4f7   :  { %868 = vrcp.f32 %v525_v7 }
 0x501   :  { %v869_v8 = vpop.eup %868 }
 0x502   :  { %v527_v9 = vmul.f32 %v869_v8, %v867_v6 }
 0x504   :  { %528 = vst [vmem:[#allocation10] sm:$0xff] %v527_v9 }
 0x505   :  { %969 = shalt.err (!%p966_p8)
}
 0x506   :  { %s970_s19 = scalar_lea.hbm %s1152_s5, 128 }
 0x507   :  { %p971_p9 = scmp.ne.s32.totalorder %s1152_s5, %s970_s19  ;;  %p974_p10 = scmp.lt.u32.totalorder %s970_s19, %s1152_s5 }
 0x509   :  { %p976_p11 = pnand %p974_p10, %p971_p9 }
 0x50b   :  { %979 = shalt.err (!%p976_p11)
}
 0x50c   :  { %538 = dma.vmem_to_hbm [thread:$0]  %s536_s15, 128, %s1152_s5, [#allocation4]  }
 0x50d   :  { %986 = dma.done.wait [#allocation4], 128  }
 0x50e   :  { %987 = vsyncadd [#allocation4], 4294967168 }
 0x50f   :  { %542 = vsyncpa [#allocation3], 1 }
 0x510   :  { %543 = vsyncpa [#allocation6], 1 }
 0x511   :  { %544 = vsyncpa [#allocation9], 1 }
 0x512   :  { %545 = vsyncpa [#allocation4], 1 }

</bundles_post_ra>
